<compile_context>
chip_gen: v6e
topology: v6e:2x2x1
jax: 0.10.0
libtpu: 0.0.40
codegen_flags: <defaults>
</compile_context>

<pallas_src>
import functools

import jax
import jax.numpy as jnp
from jax import lax
from jax.experimental import pallas as pl
from jax.experimental.pallas import tpu as pltpu


# ---------------------------------------------------------------------------
# Kernels
# ---------------------------------------------------------------------------
def _sinusoidal_mxu_kernel(x_ref, fexp_ref, b_ref, o_ref):
    # x_ref   : (TB, D)     batch tile (pipelined over the grid)
    # fexp_ref: (D, M*D)    expanded frequencies, fexp[d, m*D+d] = freq[m, d]
    # b_ref   : (1, M*D)    flattened biases (resident in VMEM)
    # o_ref   : (TB, M*D)   lane-dense output slab
    x = x_ref[...].astype(jnp.float32)
    # x @ F_exp == x[:, None, :] * freq flattened to (TB, M*D); runs on the MXU
    # (idle otherwise) instead of lane-replication + multiply on the VPU.
    xf = jnp.dot(
        x,
        fexp_ref[...],
        preferred_element_type=jnp.float32,
        precision=lax.Precision.HIGHEST,   # keep f32 accuracy for the product
    )
    y = jnp.sin(xf + b_ref[...]) * 0.5 + 0.5
    o_ref[...] = y.astype(o_ref.dtype)


def _sinusoidal_vpu_kernel(x_ref, f_ref, b_ref, o_ref):
    # Fallback path when the expanded (D, M*D) frequency matrix would not fit
    # comfortably in VMEM. f_ref/b_ref: (1, M*D) flattened parameters.
    d = x_ref.shape[1]
    m = f_ref.shape[1] // d
    x = x_ref[...].astype(jnp.float32)               # (TB, D)
    x_rep = jnp.tile(x, (1, m))                      # (TB, M*D): x replicated per membership
    y = jnp.sin(x_rep * f_ref[...] + b_ref[...]) * 0.5 + 0.5
    o_ref[...] = y.astype(o_ref.dtype)


# ---------------------------------------------------------------------------
# Tiling helpers (pure Python, trace-time)
# ---------------------------------------------------------------------------
def _vmem_plan():
    """(tile budget bytes, vmem_limit_bytes) chosen per TPU generation."""
    try:
        cap = int(pltpu.get_tpu_info().vmem_capacity_bytes)
    except Exception:
        cap = 64 * 1024 * 1024          # be conservative if the query is unavailable
    if cap >= 96 * 1024 * 1024:         # v5e / v6e: 128 MiB physical VMEM
        return 48 * 1024 * 1024, 64 * 1024 * 1024
    return 20 * 1024 * 1024, 32 * 1024 * 1024   # v7x: 64 MiB physical / 32 MiB scoped


def _choose_batch_tile(b, per_row, budget, g, target_steps=8):
    """Batch tile TB: multiple of g, divides b exactly (no pad, no result copy),
    fits `budget`, capped at 512 rows, and giving >= target_steps grid steps when
    the batch allows (pipelining + v7x megacore sharding). None if even a g-row
    tile does not fit (caller falls back to plain XLA)."""
    if per_row * g > budget:
        return None
    tb_vmem = min(budget // per_row, 512)            # 256-512 rows ~ roofline already
    tb_steps = max(g, (b // target_steps) // g * g)  # aim for >= target_steps steps
    tb = max(g, (min(tb_vmem, tb_steps) // g) * g)
    while b % tb:                                    # largest multiple of g dividing b
        tb -= g
    return tb


def sinusoidal_layer_ref(x, frequencies, biases):
    """Pure-JAX reference matching the PyTorch semantics exactly."""
    return jnp.sin(x[:, None, :] * frequencies[None] + biases[None]) * 0.5 + 0.5


# ---------------------------------------------------------------------------
# Wrapper
# ---------------------------------------------------------------------------
@functools.partial(jax.jit, static_argnames=("out_dtype", "force_kernel", "impl"))
def sinusoidal_layer(x, frequencies, biases, *, out_dtype=None, force_kernel=False,
                     impl=None):
    """x: (B, D); frequencies, biases: (M, D) -> (B, M, D).

    out_dtype=jnp.bfloat16 halves the output HBM traffic (the dominant stream);
    internal math stays f32. impl in {None (auto), "mxu", "vpu"}.
    """
    B, D = x.shape
    M, D2 = frequencies.shape
    assert D == D2 and biases.shape == (M, D)
    out_dtype = jnp.dtype(x.dtype if out_dtype is None else out_dtype)

    # Tiny problems: fixed pallas_call launch cost dwarfs the work; let XLA fuse.
    if not force_kernel and B * M * D < (1 << 15):
        return sinusoidal_layer_ref(x, frequencies, biases).astype(out_dtype)

    MD = M * D
    if impl is None:
        use_mxu = D * MD * 4 <= (4 << 20)     # expanded freq matrix stays small in VMEM
    else:
        use_mxu = impl == "mxu"

    tile_budget, vmem_limit = _vmem_plan()
    # VMEM held by the un-pipelined, resident parameter slabs (f32).
    resident = (D * MD * 4 if use_mxu else MD * 4) + MD * 4
    # Per-batch-row cost: double-buffered x & output tiles + the f32 intermediates
    # (dot result / x_rep and y) the kernel body materializes over (TB, M*D).
    per_row = 2 * (D * x.dtype.itemsize + MD * out_dtype.itemsize) + 2 * MD * 4
    budget = tile_budget - resident

    # Sublane granularity of the batch axis (8 rows for f32, 16 for bf16, 32 for int8).
    g = max(8, 32 // out_dtype.itemsize, 32 // x.dtype.itemsize)

    pad = 0
    if B % g == 0:
        tb = _choose_batch_tile(B, per_row, budget, g)
    elif per_row * B <= budget:
        # Batch not sublane-aligned but small enough for one full-array block:
        # grid=(1,), no padding, no post-kernel result copy.
        tb = B
    else:
        # Rare: unaligned *and* large. Pad the batch up to the granularity; the
        # final [:B] slice below re-copies the result once.
        pad = -B % g
        tb = _choose_batch_tile(B + pad, per_row, budget, g)

    if tb is None:
        # M*D too large for the resident-parameter single-axis layout even at the
        # minimum batch tile: stay correct via plain XLA.
        # TODO(synk): add a second grid axis over the flattened M*D dimension
        # (128-lane blocks of freq/bias/output) so huge membership counts also
        # run through the kernel instead of falling back.
        return sinusoidal_layer_ref(x, frequencies, biases).astype(out_dtype)

    if pad:
        x = jnp.pad(x, ((0, pad), (0, 0)))
    b_run = B + pad

    f32 = jnp.float32
    bias_flat = biases.reshape(1, MD).astype(f32)
    if use_mxu:
        # F_exp[d, m*D + d] = freq[m, d]  (zero elsewhere) so that
        # (x @ F_exp)[b, m*D + d] == x[b, d] * freq[m, d].
        f_param = (frequencies.astype(f32).T[:, :, None]
                   * jnp.eye(D, dtype=f32)[:, None, :]).reshape(D, MD)
        kernel = _sinusoidal_mxu_kernel
    else:
        f_param = frequencies.reshape(1, MD).astype(f32)
        kernel = _sinusoidal_vpu_kernel

    out_flat = pl.pallas_call(
        kernel,
        out_shape=jax.ShapeDtypeStruct((b_run, MD), out_dtype),
        grid_spec=pltpu.PrefetchScalarGridSpec(
            num_scalar_prefetch=0,
            grid=(b_run // tb,),
            in_specs=[
                # Batch tile of x, pipelined over the grid.
                pl.BlockSpec((tb, D), lambda i: (i, 0)),
                # Constant parameters: whole arrays resident in VMEM, no per-step
                # DMA and no double buffering (their block never changes).
                pl.BlockSpec(memory_space=pltpu.MemorySpace.VMEM),
                pl.BlockSpec(memory_space=pltpu.MemorySpace.VMEM),
            ],
            out_specs=pl.BlockSpec((tb, MD), lambda i: (i, 0)),
        ),
        compiler_params=pltpu.CompilerParams(
            dimension_semantics=("parallel",),   # megacore-shardable batch axis
            vmem_limit_bytes=vmem_limit,
        ),
    )(x, f_param, bias_flat)

    if pad:
        out_flat = out_flat[:B]
    # (B, M*D) row-major == (B, M, D) row-major: the reshape is free.
    return out_flat.reshape(B, M, D)


# ---------------------------------------------------------------------------
# Self-check
# ---------------------------------------------------------------------------
if __name__ == "__main__":
    key = jax.random.PRNGKey(0)

    def make_inputs(k, B, M, D):
        kx, kf, kb = jax.random.split(k, 3)
        x = jax.random.normal(kx, (B, D), dtype=jnp.float32)
        frequencies = jax.random.uniform(kf, (M, D), dtype=jnp.float32)  # torch.rand
        biases = jax.random.uniform(kb, (M, D), dtype=jnp.float32)       # torch.rand
        return x, frequencies, biases

    # (B, M, D, impl, out_dtype, atol)
    # The MXU-path tolerance is loose only to be robust to the MXU's f32 matmul
    # precision mode; a layout/logic bug would show errors of order 0.1+.
    checks = [
        (16, 8, 16, None,  None,         2e-2),  # auto -> MXU path, grid=(2,), M*D=128 lane-dense
        (16, 8, 16, "vpu", None,         1e-5),  # tile+multiply VPU path (exact f32 elementwise)
        (12, 8, 16, None,  None,         2e-2),  # batch not a multiple of 8 -> single full block
        (32, 8, 16, None,  jnp.bfloat16, 2e-2),  # bf16 output (halved HBM writes), 16-row tiles
    ]

    for idx, (B, M, D, impl, odt, atol) in enumerate(checks):
        key, sub = jax.random.split(key)
        x, frequencies, biases = make_inputs(sub, B, M, D)
        out = sinusoidal_layer(x, frequencies, biases, out_dtype=odt,
                               force_kernel=True, impl=impl)
        out = jax.block_until_ready(out)
        ref = sinusoidal_layer_ref(x, frequencies, biases)
        assert out.shape == (B, M, D), (idx, out.shape)
        err = float(jnp.max(jnp.abs(out.astype(jnp.float32) - ref)))
        assert err < atol, f"config {idx}: max abs err {err} >= {atol}"

    print("KERNEL_OK")
</pallas_src>

<mosaic_0001>
module attributes {stable_mosaic.version = 11 : i64} {
  func.func @_sinusoidal_mxu_kernel(%arg0: i32, %arg1: memref<8x16xf32, #tpu.memory_space<vmem>>, %arg2: memref<16x128xf32, #tpu.memory_space<vmem>>, %arg3: memref<1x128xf32, #tpu.memory_space<vmem>>, %arg4: memref<8x128xf32, #tpu.memory_space<vmem>>) attributes {dimension_semantics = [#tpu.dimension_semantics<parallel>], iteration_bounds = array<i64: 2>, scalar_prefetch = 0 : i64, scratch_operands = 0 : i64, tpu.core_type = #tpu.core_type<tc>, window_params = [{transform_indices = @transform_0, window_bounds = array<i64: 8, 16>}, {pipeline_mode = #tpu.pipeline_mode<synchronous>, transform_indices = @transform_1, window_bounds = array<i64: 16, 128>}, {pipeline_mode = #tpu.pipeline_mode<synchronous>, transform_indices = @transform_2, window_bounds = array<i64: 1, 128>}, {transform_indices = @transform_3, window_bounds = array<i64: 8, 128>}]} {
    %c0 = arith.constant 0 : index
    %c0_0 = arith.constant 0 : index
    %0 = vector.load %arg1[%c0, %c0_0] : memref<8x16xf32, #tpu.memory_space<vmem>>, vector<8x16xf32>
    %c0_1 = arith.constant 0 : index
    %c0_2 = arith.constant 0 : index
    %1 = vector.load %arg2[%c0_1, %c0_2] : memref<16x128xf32, #tpu.memory_space<vmem>>, vector<16x128xf32>
    %cst = arith.constant dense<0.000000e+00> : vector<8x128xf32>
    %2 = tpu.matmul %0, %1, %cst {dimension_numbers = #tpu.dot_dimension_numbers<[1], [0], [0], [1], [0, 0, 1, 1], [], []>, precision = #tpu.contract_precision<fp32>} : vector<8x16xf32>, vector<16x128xf32>, vector<8x128xf32> -> vector<8x128xf32>
    %c0_3 = arith.constant 0 : index
    %c0_4 = arith.constant 0 : index
    %3 = vector.load %arg3[%c0_3, %c0_4] : memref<1x128xf32, #tpu.memory_space<vmem>>, vector<1x128xf32>
    %4 = vector.broadcast %3 : vector<1x128xf32> to vector<8x128xf32>
    %5 = arith.addf %2, %4 : vector<8x128xf32>
    %6 = math.sin %5 : vector<8x128xf32>
    %cst_5 = arith.constant 5.000000e-01 : f32
    %7 = vector.broadcast %cst_5 : f32 to vector<8x128xf32>
    %8 = arith.mulf %6, %7 : vector<8x128xf32>
    %cst_6 = arith.constant 5.000000e-01 : f32
    %9 = vector.broadcast %cst_6 : f32 to vector<8x128xf32>
    %10 = arith.addf %8, %9 : vector<8x128xf32>
    %c0_7 = arith.constant 0 : index
    %c0_8 = arith.constant 0 : index
    %11 = vector.load %arg4[%c0_7, %c0_8] : memref<8x128xf32, #tpu.memory_space<vmem>>, vector<8x128xf32>
    tpu.vector_store %arg4[%c0_7, %c0_8], %10 {strides = array<i32>} : memref<8x128xf32, #tpu.memory_space<vmem>>, vector<8x128xf32>,
    return
  }
  func.func @transform_0(%arg0: i32) -> (i32, i32) {
    %c0_i32 = arith.constant 0 : i32
    %c0_i32_0 = arith.constant 0 : i32
    return %arg0, %c0_i32 : i32, i32
  }
  func.func @transform_1(%arg0: i32) -> (i32, i32) {
    %c0_i32 = arith.constant 0 : i32
    %c0_i32_0 = arith.constant 0 : i32
    %c0_i32_1 = arith.constant 0 : i32
    return %c0_i32, %c0_i32_0 : i32, i32
  }
  func.func @transform_2(%arg0: i32) -> (i32, i32) {
    %c0_i32 = arith.constant 0 : i32
    %c0_i32_0 = arith.constant 0 : i32
    %c0_i32_1 = arith.constant 0 : i32
    return %c0_i32, %c0_i32_0 : i32, i32
  }
  func.func @transform_3(%arg0: i32) -> (i32, i32) {
    %c0_i32 = arith.constant 0 : i32
    %c0_i32_0 = arith.constant 0 : i32
    return %arg0, %c0_i32 : i32, i32
  }
}

</mosaic_0001>

<bundles_post_ra>
// kernel: sinusoidal_layer.1
= control target key start
LH: loop header
LB: loop body
LE: loop exit
PB: predicated region body
PF: predicated region fallthrough
CT: control target
= control target key end

     0   :  { %s933_s12 = smov 0   ;;  %s993_s0 = inlined_call_operand.vmem [shape: f32[16,16], index: 0, kind: input, shape index: {}]   ;;  %s994_s1 = inlined_call_operand.vmem [shape: f32[16,128], index: 1, kind: input, shape index: {}]   ;;  %s995_s2 = inlined_call_operand.vmem [shape: f32[1,128], index: 2, kind: input, shape index: {}]   ;;  %s996_s3 = inlined_call_operand.vmem [shape: f32[16,128], index: 3, kind: output, shape index: {}]  }
   0x1 LB: > { %s799_s13 = sadd.s32 4294967295, %s903_s12   ;;  %p803_p0 = scmp.ge.s32.totalorder %s903_s12, 1  ;;  %s903_s12 = sphi %s933_s12, %s13_s12  }
   0x2   : > { %p136_p1 = scmp.lt.s32.totalorder %s903_s12, 3 }
   0x4   : > { %p137_p2 = pnand %p803_p0, %p136_p1 }
   0x5   : > { %p158_p3 = scmp.lt.s32.totalorder (!%p137_p2), %s799_s13, 1 }
   0x6   : > { %140 = sbr.rel (%p137_p2) target bundleno = 320 (0x140), region = 32 }
   0xb   : > { %v168_v0 = vld [vmem:[%s994_s1 + $0x8] sm:$0xff]  ;;  %v167_v1 = vld [vmem:[%s994_s1] sm:$0xff]  ;;  %v905_v2 = vmov 0.0   ;;  %vm906_vm0 = vmmov 0   ;;  %s998_s13 = smov (!%p158_p3, %s799_s13), 1  ;;  %vm176_vm1 = vcmask 130048  }
   0xc   : > { %831 = vmatprep.subr.mxu0 %v905_v2  ;;  %v209_v3 = vand.u32 4294901760, %v168_v0  ;;  %838 = vmatprep.subr.mxu1 %v905_v2  ;;  %v212_v4 = vand.u32 4294901760, %v167_v1  ;;  %s804_s18 = sshll.u32 %s998_s13, 3  ;;  %v806_v21 = vld [vmem:[%s995_s2] ss:$0 sm:$0xff] }
   0xd   : > { %835 = vmatprep.mubr.msk.f32.mxu0 %vm906_vm0, %v905_v2  ;;  %842 = vmatprep.mubr.msk.f32.mxu1 %vm906_vm0, %v905_v2  ;;  %s161_s21 = scalar_lea.vmem %s993_s0, %s804_s18  ;;  %v907_v49 = vmov 683565275   ;;  %v908_v51 = vmov 2475754826   ;;  %v909_v54 = vmov 2131351028   ;;  %s165_s26 = scalar_lea.vmem %s996_s3, %s804_s18 }
   0xe   : > { %832 = vmatpush3.msra.mxu0 %v209_v3  ;;  %v287_v5 = vsub.f32 %v168_v0, %v209_v3  ;;  %v294_v6 = vsub.f32 %v167_v1, %v212_v4  ;;  %v166_v9 = vld [vmem:[%s161_s21] sm:$0xff]  ;;  %v910_v57 = vmov 2102212464   ;;  %v911_v60 = vmov 920167782  }
   0xf   : > { %833 = vmatprep.subr.mxu0 %v905_v2  ;;  %v178_v12 = vsel %vm176_vm1, %v166_v9, 0  ;;  %v912_v63 = vmov 1326507024  }
  0x10   : > { %v288_v7 = vand.u32 4294901760, %v287_v5  ;;  %834 = vmatpush3.msra.mxu0 %v212_v4  ;;  %v295_v8 = vand.u32 4294901760, %v294_v6  ;;  %v247_v13 = vand.u32 4294901760, %v178_v12 }
  0x11   : > { %845 = vmatprep.subr.mxu0 %v905_v2 }
  0x12   : > { %v289_v10 = vsub.f32 %v287_v5, %v288_v7  ;;  %v296_v11 = vsub.f32 %v294_v6, %v295_v8  ;;  %v248_v16 = vsub.f32 %v178_v12, %v247_v13 }
  0x14   : > { %v290_v14 = vand.u32 4294901760, %v289_v10  ;;  %v297_v15 = vand.u32 4294901760, %v296_v11  ;;  %v249_v17 = vand.u32 4294901760, %v248_v16 }
  0x16   : > { %839 = vmatpush3.msra.mxu1 %v290_v14  ;;  %v250_v18 = vsub.f32 %v248_v16, %v249_v17 }
  0x17   : > { %840 = vmatprep.subr.mxu1 %v905_v2 }
  0x18   : > { %841 = vmatpush3.msra.mxu1 %v297_v15  ;;  %v251_v19 = vand.u32 4294901760, %v250_v18 }
  0x19   : > { %843 = vmatmul.mubr.f32.vlgmr.msra.gmra.mxu1 %v247_v13  ;;  %852 = vmatprep.subr.mxu1 %v905_v2 }
  0x1a   : > { %853 = vmatpush3.msra.mxu1 %v209_v3  ;;  %856 = vmatprep.mubr.msk.f32.mxu1 %vm906_vm0, %v905_v2 }
  0x1b   : > { %854 = vmatprep.subr.mxu1 %v905_v2  ;;  %836 = vmatmul.mubr.f32.vlgmr.msra.gmra.mxu0 %v251_v19 }
  0x1c   : > { %855 = vmatpush3.msra.mxu1 %v212_v4  ;;  %846 = vmatpush3.msra.mxu0 %v287_v5 }
  0x1d   : > { %857 = vmatmul.mubr.f32.vlgmr.msra.gmra.mxu1 %v249_v17  ;;  %849 = vmatprep.mubr.msk.f32.mxu0 %vm906_vm0, %v905_v2 }
  0x1e   : > { %847 = vmatprep.subr.mxu0 %v905_v2  ;;  %866 = vmatprep.subr.mxu1 %v905_v2 }
  0x1f   : > { %848 = vmatpush3.msra.mxu0 %v294_v6  ;;  %867 = vmatpush3.msra.mxu1 %v209_v3 }
  0x20   : > { %859 = vmatprep.subr.mxu0 %v905_v2  ;;  %850 = vmatmul.mubr.f32.vlgmr.msra.gmra.mxu0 %v248_v16 }
  0x21   : > { %860 = vmatpush3.msra.mxu0 %v288_v7  ;;  %868 = vmatprep.subr.mxu1 %v905_v2 }
  0x22   : > { %861 = vmatprep.subr.mxu0 %v905_v2  ;;  %863 = vmatprep.mubr.msk.f32.mxu0 %vm906_vm0, %v905_v2 }
  0x23   : > { %862 = vmatpush3.msra.mxu0 %v295_v8  ;;  %869 = vmatpush3.msra.mxu1 %v212_v4 }
  0x24   : > { %870 = vmatprep.mubr.msk.f32.mxu1 %vm906_vm0, %v905_v2  ;;  %864 = vmatmul.mubr.f32.vlgmr.msra.gmra.mxu0 %v247_v13 }
  0x25   : > { %871 = vmatmul.mubr.f32.vlgmr.msra.gmra.mxu1 %v247_v13 }
  0xd9   : > { %v334_v20 = vpop.f32.mrf.mxu1 }
  0xdb   : > { %v844_v22 = vpop.f32.mrf.mxu1  ;;  %v253_v23 = vpop.f32.mrf.mxu0 }
  0xdc   : > { %v254_v25 = vadd.f32 %v806_v21, %v253_v23 }
  0xdd   : > { %v485_v24 = vpop.f32.mrf.mxu1  ;;  %v837_v26 = vpop.f32.mrf.mxu0 }
  0xde   : > { %v335_v28 = vadd.f32 %v334_v20, %v254_v25 }
  0xdf   : > { %v858_v27 = vpop.f32.mrf.mxu1 }
  0xe0   : > { %v410_v29 = vpop.f32.mrf.mxu0 }
  0xe1   : > { %v411_v30 = vadd.f32 %v410_v29, %v335_v28 }
  0xe2   : > { %v851_v31 = vpop.f32.mrf.mxu0 }
  0xe3   : > { %v486_v32 = vadd.f32 %v485_v24, %v411_v30 }
  0xe4   : > { %v562_v33 = vpop.f32.mrf.mxu0 }
  0xe5   : > { %v563_v34 = vadd.f32 %v562_v33, %v486_v32  ;;  %v635_v35 = vpop.f32.mrf.mxu1 }
  0xe6   : > { %v865_v36 = vpop.f32.mrf.mxu0 }
  0xe7   : > { %v964_v37 = vadd.f32 %v635_v35, %v563_v34  ;;  %v872_v38 = vpop.f32.mrf.mxu1 }
  0xe9   : > { %v642_v39 = vand.u32 2139095040, %v964_v37  ;;  %v639_v43 = vand.u32 2147483647, %v964_v37  ;;  %vm641_vm9 = vcmp.lt.s32.totalorder %v964_v37, 0  ;;  %vm731_vm14 = vweird.f32 %v964_v37 }
  0xeb   : > { %v643_v40 = vshrl.u32 %v642_v39, 23  ;;  %v646_v46 = vand.u32 8388607, %v639_v43  ;;  %vm640_vm10 = vcmp.le.f32.partialorder %v639_v43, 0.7853982 }
  0xed   : > { %v807_v41 = vadd.s32 4294967169, %v643_v40  ;;  %v647_v1 = vor.u32 8388608, %v646_v46 }
  0xef   : > { %v649_v42 = vadd.s32 1, %v807_v41  ;;  %v687_v15 = vshll.u32 %v647_v1, 8 }
  0xf1   : > { %vm650_vm2 = vcmp.gt.s32.totalorder %v649_v42, 0 }
  0xf2   : > { %v651_v44 = vsel %vm650_vm2, %v649_v42, 0 }
  0xf3   : > { %v653_v45 = vand.u32 31, %v651_v44  ;;  %v652_v48 = vshrl.u32 %v651_v44, 5 }
  0xf5   : > { %v654_v47 = vsub.s32 32, %v653_v45  ;;  %v656_v50 = vshll.u32 %v907_v49, %v653_v45  ;;  %v659_v52 = vshll.u32 %v908_v51, %v653_v45  ;;  %v662_v56 = vshll.u32 %v909_v54, %v653_v45 }
  0xf6   : > { %v665_v59 = vshll.u32 %v910_v57, %v653_v45  ;;  %v668_v62 = vshll.u32 %v911_v60, %v653_v45  ;;  %vm671_vm3 = vcmp.lt.s32.totalorder %v652_v48, 1  ;;  %vm674_vm4 = vcmp.lt.s32.totalorder %v652_v48, 4 }
  0xf7   : > { %v657_v53 = vshrl.u32 %v908_v51, %v654_v47  ;;  %v660_v55 = vshrl.u32 %v909_v54, %v654_v47  ;;  %v663_v58 = vshrl.u32 %v910_v57, %v654_v47  ;;  %v666_v61 = vshrl.u32 %v911_v60, %v654_v47 }
  0xf8   : > { %v669_v0 = vshrl.u32 %v912_v63, %v654_v47  ;;  %v655_v10 = vshrl.u32 %v907_v49, %v654_v47  ;;  %vm673_vm5 = vcmp.lt.s32.totalorder %v652_v48, 3  ;;  %vm672_vm6 = vcmp.lt.s32.totalorder %v652_v48, 2 }
  0xf9   : > { %v658_v2 = vor.u32 %v657_v53, %v656_v50  ;;  %v661_v3 = vor.u32 %v660_v55, %v659_v52  ;;  %v664_v4 = vor.u32 %v663_v58, %v662_v56  ;;  %v667_v5 = vor.u32 %v666_v61, %v665_v59 }
  0xfa   : > { %v670_v6 = vor.u32 %v669_v0, %v668_v62 }
  0xfb   : > { %v676_v7 = vsel %vm674_vm4, %v664_v4, 2102212464  ;;  %v679_v8 = vsel %vm671_vm3, %v658_v2, %v661_v3  ;;  %v683_v9 = vsel %vm671_vm3, %v661_v3, %v664_v4  ;;  %v680_v11 = vsel %vm674_vm4, %v667_v5, 920167782 }
  0xfc   : > { %v684_v12 = vsel %vm674_vm4, %v670_v6, 1326507024  ;;  %v681_v13 = vsel %vm673_vm5, %v664_v4, %v680_v11  ;;  %v675_v16 = vsel %vm671_vm3, %v655_v10, %v658_v2  ;;  %v677_v17 = vsel %vm673_vm5, %v661_v3, %v676_v7 }
  0xfd   : > { %v685_v14 = vsel %vm673_vm5, %v667_v5, %v684_v12  ;;  %v682_v18 = vsel %vm672_vm6, %v679_v8, %v681_v13  ;;  %v678_v24 = vsel %vm672_vm6, %v675_v16, %v677_v17 }
  0xfe   : > { %v686_v19 = vsel %vm672_vm6, %v683_v9, %v685_v14  ;;  %v973_v22 = vmul.u32.u64.low %v687_v15, %v682_v18  ;;  %v974_v23 = vmul.u32.u64.high %v687_v15, %v682_v18, %v973_v22  ;;  %v694_v26 = vmul.u32 %v687_v15, %v678_v24 }
  0xff   : > { %v970_v20 = vmul.u32.u64.low %v687_v15, %v686_v19  ;;  %v971_v21 = vmul.u32.u64.high %v687_v15, %v686_v19, %v970_v20 }
 0x100   : > { %v697_v25 = vadd.s32 1, %v974_v23 }
 0x101   : > { %vm696_vm7 = vc.u32 %v971_v21, %v973_v22  ;;  %v695_v39 = vadd.s32 %v973_v22, %v971_v21 }
 0x102   : > { %v698_v27 = vsel %vm696_vm7, %v697_v25, %v974_v23 }
 0x103   : > { %v699_v28 = vadd.s32 %v698_v27, %v694_v26 }
 0x105   : > { %v700_v29 = vadd.s32 536870912, %v699_v28 }
 0x107   : > { %v701_v30 = vshrl.u32 %v700_v29, 30 }
 0x109   : > { %v702_v31 = vshll.u32 %v701_v30, 30  ;;  %v725_v53 = vsub.s32 4, %v701_v30 }
 0x10b   : > { %v703_v32 = vsub.s32 %v699_v28, %v702_v31  ;;  %v726_v56 = vsel %vm641_vm9, %v725_v53, %v701_v30 }
 0x10c   : > { %v728_v57 = vsel %vm640_vm10, 0, %v726_v56 }
 0x10d   : > { %v705_v33 = vsub.s32 0, %v703_v32  ;;  %v732_v58 = vadd.s32 3, %v728_v57 }
 0x10f   : > { %v808_v34 = vmin.u32 %v705_v33, %v703_v32  ;;  %v733_v59 = vand.u32 3, %v732_v58 }
 0x111   : > { %v707_v35 = vclz %v808_v34  ;;  %vm738_vm11 = vcmp.eq.s32.totalorder %v733_v59, 2  ;;  %vm735_vm12 = vcmp.eq.s32.totalorder %v733_v59, 0  ;;  %vm734_vm13 = vcmp.lt.s32.totalorder %v733_v59, 2 }
 0x113   : > { %v809_v36 = vadd.s32 4294967294, %v707_v35 }
 0x115   : > { %vm810_vm8 = vcmp.lt.s32.totalorder %v809_v36, 0 }
 0x116   : > { %v710_v38 = vsel %vm810_vm8, 0, %v809_v36 }
 0x117   : > { %v711_v40 = vsub.s32 32, %v710_v38  ;;  %v715_v41 = vsub.s32 4294967266, %v710_v38  ;;  %v712_v42 = vshll.u32 %v703_v32, %v710_v38 }
 0x119   : > { %v713_v44 = vshrl.u32 %v695_v39, %v711_v40  ;;  %v716_v45 = vadd.s32 127, %v715_v41 }
 0x11b   : > { %v714_v46 = vor.u32 %v713_v44, %v712_v42  ;;  %v717_v47 = vshll.u32 %v716_v45, 23 }
 0x11d   : > { %v718_v48 = vor.u32 4788187, %v717_v47  ;;  %v721_v50 = vcvt.s32.f32 %v714_v46 }
 0x11f   : > { %v719_v49 = vand.u32 2147483647, %v718_v48 }
 0x121   : > { %v722_v51 = vmul.f32 %v721_v50, %v719_v49 }
 0x123   : > { %v723_v52 = vxor.u32 2147483648, %v722_v51 }
 0x125   : > { %v724_v54 = vsel %vm641_vm9, %v723_v52, %v722_v51 }
 0x126   : > { %v727_v55 = vsel %vm640_vm10, %v964_v37, %v724_v54 }
 0x127   : > { %893 = vcosq.f32 %v727_v55 }
 0x128   : > { %895 = vsinq.f32 %v727_v55 }
 0x134   : > { %v894_v60 = vpop.eup %893 }
 0x135   : > { %v896_v61 = vpop.eup %895  ;;  %v739_v62 = vxor.u32 2147483648, %v894_v60 }
 0x136   : > { %v736_v63 = vxor.u32 2147483648, %v896_v61 }
 0x137   : > { %v740_v0 = vsel %vm738_vm11, %v739_v62, %v896_v61 }
 0x138   : > { %v737_v1 = vsel %vm735_vm12, %v894_v60, %v736_v63 }
 0x139   : > { %v741_v43 = vsel %vm734_vm13, %v737_v1, %v740_v0 }
 0x13a   : > { %v742_v2 = vsel %vm731_vm14, nan, %v741_v43 }
 0x13b   : > { %v743_v3 = vmul.f32 0.5, %v742_v2 }
 0x13d   : > { %v744_v4 = vadd.f32 0.5, %v743_v3 }
 0x13f   : > { %745 = vst [vmem:[%s165_s26] sm:$0xff] %v744_v4 }
 0x140 PF: > { %s13_s12 = sadd.s32 1, %s903_s12  }
 0x141   : > { %p10_p4 = scmp.ge.s32.totalorder %s13_s12, 4  }
 0x143   :  { %12 = sbr.rel (!%p10_p4) target bundleno = 1 (0x1), region = 62 }

</bundles_post_ra>
